<compile_context>
chip_gen: v5e
topology: v5e:2x2
jax: 0.10.0
libtpu: 0.0.40
codegen_flags: <defaults>
</compile_context>

<pallas_src>
import math

import jax
import jax.numpy as jnp
from jax.experimental import pallas as pl
from jax.experimental.pallas import tpu as pltpu


def _residual_kernel(x_ref, y_ref, o_ref):
    # Elementwise residual add on the full VMEM tile (VPU).
    o_ref[...] = y_ref[...] + x_ref[...]


_SMALL_INPUT_BYTES = 1 << 20     # below this, XLA fusion beats a kernel launch
_VMEM_LIMIT_FLOOR = 16 << 20     # never request less scoped VMEM than this
_VMEM_LIMIT_MARGIN = 4 << 20     # headroom for compiler-internal scratch


def _target_block_bytes() -> int:
    """Per-operand VMEM block budget, generation aware."""
    try:
        info = pltpu.get_tpu_info()
        vmem = getattr(info, "vmem_capacity_bytes", None)
        if vmem is not None and vmem >= (96 << 20):
            return 8 << 20       # 128 MiB-VMEM parts (v5e / v6e): bigger tiles are free
    except Exception:
        pass
    return 4 << 20               # v7x (64 MiB VMEM) / unknown: stay conservative


def _pick_lanes(total: int) -> int:
    """Widest lane-dense last dim (multiple of 128) dividing the element count."""
    for cand in (4096, 2048, 1024, 512, 256, 128):
        if total % cand == 0:
            return cand
    return 0


def _choose_tile_rows(rows: int, sublane: int, budget_rows: int) -> int:
    """Pick tile_rows: a multiple of `sublane`, <= budget_rows.

    Preference order: (a) even grid of >= 4 steps, (b) even grid of >= 2 steps,
    (c) any grid of >= 2 steps, (d) single step; within a rank prefer exact
    divisors of `rows` (no masked tail block), then the largest tile.
    """
    budget_rows = max(sublane, (budget_rows // sublane) * sublane)
    if rows < 2 * sublane:
        # Too few rows to split into sublane-aligned tiles; a single full-dim
        # block is always legal (only hit via force_pallas on tiny inputs).
        return rows

    candidates = set()
    # Divisors of rows that are sublane multiples within the budget.
    i = 1
    while i * i <= rows:
        if rows % i == 0:
            for d in (i, rows // i):
                if d % sublane == 0 and sublane <= d <= budget_rows:
                    candidates.add(d)
        i += 1
    # Budget tile and its halvings (non-divisor fallback -> masked tail block).
    t = min(budget_rows, (rows // sublane) * sublane)
    while t >= sublane:
        candidates.add(t)
        nt = ((t // 2) // sublane) * sublane
        if nt == t:
            break
        t = nt

    def score(tr):
        steps = -(-rows // tr)   # cdiv
        if steps >= 4 and steps % 2 == 0:
            rank = 0
        elif steps >= 2 and steps % 2 == 0:
            rank = 1
        elif steps >= 2:
            rank = 2
        else:
            rank = 3
        return (rank, 0 if rows % tr == 0 else 1, -tr)

    return min(candidates, key=score)


def _vmem_limit_bytes(tile_rows: int, lanes: int, itemsize: int) -> int:
    # (2 inputs + 1 output) x 2 double buffers of one tile, plus margin.
    footprint = 3 * 2 * tile_rows * lanes * itemsize
    return max(footprint + _VMEM_LIMIT_MARGIN, _VMEM_LIMIT_FLOOR)


def residual(x: jax.Array, y: jax.Array, *, force_pallas: bool = False,
             donate_x: bool = False) -> jax.Array:
    """res = y + x (Residual.forward), computed in a Pallas TPU kernel.

    x, y: arrays of identical shape/dtype, e.g. (batch, seq, hidden).
    force_pallas=True bypasses the small-input fast path (testing). Note it is
    still ignored when the element count is not a multiple of 128 (padding
    would roughly double HBM traffic for this purely mem-bound op).
    donate_x=True aliases the output onto x's buffer (caller should donate x,
    e.g. via jax.jit donate_argnums, to actually avoid the extra allocation).
    """
    assert x.shape == y.shape and x.dtype == y.dtype
    orig_shape = x.shape
    dtype = x.dtype
    itemsize = jnp.dtype(dtype).itemsize
    total = math.prod(orig_shape) if orig_shape else 1
    total_bytes = total * itemsize

    # Fast path: tiny residual adds are dominated by launch/pipeline overhead.
    if not force_pallas and total_bytes < _SMALL_INPUT_BYTES:
        return y + x

    # Lane-dense slab: flatten (elementwise op -> any contiguous 2-D view is
    # valid) with the widest lane count dividing the element count, so stores
    # are full unmasked vst's even when hidden < 128.
    lanes = _pick_lanes(total)
    if lanes == 0:
        return y + x

    rows = total // lanes
    x2 = x.reshape(rows, lanes)   # contiguous reshape == free layout plumbing
    y2 = y.reshape(rows, lanes)

    # Sublane packing factor: 8 (32-bit), 16 (bf16/f16), 32 (int8/fp8).
    sublane = 8 * max(1, 4 // itemsize)
    budget_rows = max(1, _target_block_bytes() // (lanes * itemsize))
    tile_rows = _choose_tile_rows(rows, sublane, budget_rows)
    grid = (pl.cdiv(rows, tile_rows),)

    extra_kwargs = {}
    if donate_x:
        extra_kwargs["input_output_aliases"] = {0: 0}

    out2 = pl.pallas_call(
        _residual_kernel,
        out_shape=jax.ShapeDtypeStruct((rows, lanes), dtype),
        grid_spec=pltpu.PrefetchScalarGridSpec(
            num_scalar_prefetch=0,
            grid=grid,
            in_specs=[
                pl.BlockSpec((tile_rows, lanes), lambda i: (i, 0)),
                pl.BlockSpec((tile_rows, lanes), lambda i: (i, 0)),
            ],
            out_specs=pl.BlockSpec((tile_rows, lanes), lambda i: (i, 0)),
        ),
        compiler_params=pltpu.CompilerParams(
            # Independent tiles: shards the grid across the 2 TensorCores on
            # v7x (grid is kept even when possible); harmless on v5e/v6e.
            dimension_semantics=("parallel",),
            vmem_limit_bytes=_vmem_limit_bytes(tile_rows, lanes, itemsize),
        ),
        cost_estimate=pl.CostEstimate(
            flops=total, transcendentals=0, bytes_accessed=3 * total_bytes),
        **extra_kwargs,
    )(x2, y2)

    return out2.reshape(orig_shape)


class Residual:
    """Drop-in equivalent of the PyTorch module (no parameters)."""

    def __init__(self, embedding_dim):
        del embedding_dim  # creates no parameters in the reference module

    def __call__(self, x, y):
        return residual(x, y)


if __name__ == "__main__":
    key = jax.random.PRNGKey(0)
    kx, ky, kx2, ky2, kx3, ky3 = jax.random.split(key, 6)

    # 1) Small shape matching the module's typical use: (batch=2, seq=8,
    #    hidden=32). Force the Pallas path so the kernel itself is exercised.
    x_s = jax.random.normal(kx, (2, 8, 32), dtype=jnp.float32)
    y_s = jax.random.normal(ky, (2, 8, 32), dtype=jnp.float32)
    out_s = residual(x_s, y_s, force_pallas=True)
    jax.block_until_ready(out_s)
    ref_s = y_s + x_s
    assert out_s.shape == ref_s.shape and out_s.dtype == ref_s.dtype
    assert jnp.allclose(out_s, ref_s, atol=1e-6), "small-shape mismatch vs reference"

    # Default wrapper (small-input fast path, via the module-like class).
    layer = Residual(32)
    out_fast = layer(x_s, y_s)
    jax.block_until_ready(out_fast)
    assert jnp.allclose(out_fast, ref_s, atol=1e-6), "fast-path mismatch vs reference"

    # 2) Large f32 shape: exercises the tiled multi-step Pallas path
    #    (lane-dense slab, divisor tiles, grid with >=4 even steps).
    x_l = jax.random.normal(kx2, (4, 1024, 1024), dtype=jnp.float32)
    y_l = jax.random.normal(ky2, (4, 1024, 1024), dtype=jnp.float32)
    ref_l = y_l + x_l
    out_l = residual(x_l, y_l)
    jax.block_until_ready(out_l)
    assert out_l.shape == ref_l.shape and out_l.dtype == ref_l.dtype
    assert jnp.allclose(out_l, ref_l, atol=1e-6), "large-shape mismatch vs reference"

    # 2b) Same data through the output-aliasing path (x not reused afterwards).
    out_a = residual(x_l, y_l, donate_x=True)
    jax.block_until_ready(out_a)
    assert jnp.allclose(out_a, ref_l, atol=1e-6), "aliased-output mismatch vs reference"

    # 3) bf16 shape: exercises the 16-row sublane packing + divisor tile search.
    x_b = jax.random.normal(kx3, (8, 512, 640), dtype=jnp.bfloat16)
    y_b = jax.random.normal(ky3, (8, 512, 640), dtype=jnp.bfloat16)
    out_b = residual(x_b, y_b)
    jax.block_until_ready(out_b)
    ref_b = y_b + x_b
    assert out_b.shape == ref_b.shape and out_b.dtype == ref_b.dtype
    assert jnp.allclose(out_b.astype(jnp.float32), ref_b.astype(jnp.float32),
                        atol=1e-2), "bf16-shape mismatch vs reference"

    print("KERNEL_OK")
</pallas_src>

<mosaic_0001>
module attributes {stable_mosaic.version = 11 : i64} {
  func.func @_residual_kernel(%arg0: i32, %arg1: memref<1x512xf32, #tpu.memory_space<vmem>>, %arg2: memref<1x512xf32, #tpu.memory_space<vmem>>, %arg3: memref<1x512xf32, #tpu.memory_space<vmem>>) attributes {dimension_semantics = [#tpu.dimension_semantics<parallel>], iteration_bounds = array<i64: 1>, scalar_prefetch = 0 : i64, scratch_operands = 0 : i64, tpu.core_type = #tpu.core_type<tc>, window_params = [{transform_indices = @transform_0, window_bounds = array<i64: 1, 512>}, {transform_indices = @transform_1, window_bounds = array<i64: 1, 512>}, {transform_indices = @transform_2, window_bounds = array<i64: 1, 512>}]} {
    %c0 = arith.constant 0 : index
    %c0_0 = arith.constant 0 : index
    %0 = vector.load %arg2[%c0, %c0_0] : memref<1x512xf32, #tpu.memory_space<vmem>>, vector<1x512xf32>
    %c0_1 = arith.constant 0 : index
    %c0_2 = arith.constant 0 : index
    %1 = vector.load %arg1[%c0_1, %c0_2] : memref<1x512xf32, #tpu.memory_space<vmem>>, vector<1x512xf32>
    %2 = arith.addf %0, %1 : vector<1x512xf32>
    %c0_3 = arith.constant 0 : index
    %c0_4 = arith.constant 0 : index
    %3 = vector.load %arg3[%c0_3, %c0_4] : memref<1x512xf32, #tpu.memory_space<vmem>>, vector<1x512xf32>
    tpu.vector_store %arg3[%c0_3, %c0_4], %2 {strides = array<i32>} : memref<1x512xf32, #tpu.memory_space<vmem>>, vector<1x512xf32>,
    return
  }
  func.func @transform_0(%arg0: i32) -> (i32, i32) {
    %c0_i32 = arith.constant 0 : i32
    %c0_i32_0 = arith.constant 0 : i32
    return %arg0, %c0_i32 : i32, i32
  }
  func.func @transform_1(%arg0: i32) -> (i32, i32) {
    %c0_i32 = arith.constant 0 : i32
    %c0_i32_0 = arith.constant 0 : i32
    return %arg0, %c0_i32 : i32, i32
  }
  func.func @transform_2(%arg0: i32) -> (i32, i32) {
    %c0_i32 = arith.constant 0 : i32
    %c0_i32_0 = arith.constant 0 : i32
    return %arg0, %c0_i32 : i32, i32
  }
}

</mosaic_0001>

<bundles_post_ra>
// kernel: tpu_custom_call.1
= control target key start
LH: loop header
LB: loop body
LE: loop exit
PB: predicated region body
PF: predicated region fallthrough
CT: control target
= control target key end

     0   :  { %7 = vsyncpa [#allocation3], 0  ;;  %s174_s0 = inlined_call_operand.hbm [shape: f32[1,512], index: 0, kind: input, shape index: {}]   ;;  %s175_s1 = inlined_call_operand.hbm [shape: f32[1,512], index: 1, kind: input, shape index: {}]   ;;  %s176_s2 = inlined_call_operand.hbm [shape: f32[1,512], index: 2, kind: output, shape index: {}]  }
   0x1   :  { %8 = vsyncpa [#allocation6], 0 }
   0x2   :  { %9 = vsyncpa [#allocation4], 0  ;;  %s15_s11 = sshll.u32 %s174_s0, 4  ;;  %s147_s12 = smov [#allocation2]   ;;  %s16_s11 = int_to_ptr.hbm [resolvable:$true] %s15_s11 }
   0x3   :  { %s17_s13 = sshll.u32 %s147_s12, 4  ;;  %s26_s16 = sshll.u32 %s175_s1, 4  ;;  %s18_s13 = int_to_ptr.vmem [resolvable:$true] %s17_s13  ;;  %s27_s16 = int_to_ptr.hbm [resolvable:$true] %s26_s16 }
   0x4   :  { %20 = dma.hbm_to_vmem [thread:$0]  %s16_s11, 64, %s18_s13, [#allocation3]  }
   0x5   :  { %s148_s17 = smov [#allocation5]  }
   0x6   :  { %s28_s18 = sshll.u32 %s148_s17, 4  ;;  %s29_s18 = int_to_ptr.vmem [resolvable:$true] %s28_s18 }
   0x7   :  { %31 = dma.hbm_to_vmem [thread:$0]  %s27_s16, 64, %s29_s18, [#allocation6]  }
   0x8   :  { %141 = dma.done.wait [#allocation3], 64  }
   0x9   :  { %142 = vsyncadd [#allocation3], 4294967232 }
   0xa   :  { %143 = dma.done.wait [#allocation6], 64  }
   0xb   :  { %144 = vsyncadd [#allocation6], 4294967232  ;;  %v43_v0 = vlaneseq  ;;  %s149_s0 = smov [#allocation7]   ;;  %s55_s22 = sshll.u32 %s176_s2, 4  ;;  %v40_v1 = vld [vmem:[#allocation5] sm:$0xf]  ;;  %s56_s22 = int_to_ptr.hbm [resolvable:$true] %s55_s22 }
   0xc   :  { %s53_s19 = sshll.u32 %s149_s0, 4  ;;  %v41_v2 = vld [vmem:[#allocation2] sm:$0xf]  ;;  %s54_s19 = int_to_ptr.vmem [resolvable:$true] %s53_s19 }
   0xd   :  { %vm45_vm0 = vcmp.lt.s32.totalorder %v43_v0, 512  ;;  %v42_v3 = vadd.f32 %v41_v2, %v40_v1 }
   0xf   :  { %47 = vst.msk [vmem:[#allocation7] sm:$0xf] %vm45_vm0, %v42_v3 }
  0x10   :  { %58 = dma.vmem_to_hbm [thread:$0]  %s54_s19, 64, %s56_s22, [#allocation4]  }
  0x11   :  { %145 = dma.done.wait [#allocation4], 64  }
  0x12   :  { %146 = vsyncadd [#allocation4], 4294967232 }
  0x13   :  { %63 = vsyncpa [#allocation3], 1 }
  0x14   :  { %64 = vsyncpa [#allocation6], 1 }
  0x15   :  { %65 = vsyncpa [#allocation4], 1 }

</bundles_post_ra>
